<compile_context>
chip_gen: v7x
topology: tpu7x:2x2x1
jax: 0.10.0
libtpu: 0.0.40
codegen_flags: <defaults>
</compile_context>

<pallas_src>
import functools

import jax
import jax.numpy as jnp
from jax.experimental import pallas as pl
from jax.experimental.pallas import tpu as pltpu


def _round_up(x, m):
    return (x + m - 1) // m * m


def onehot_proj_kernel(idx_ref, wt_ref, b_ref, out_ref):
    # idx_ref: (TN, 1)  int32   -- token labels for this row tile
    # wt_ref : (L, TE)  float32 -- transposed Linear weight slab (resident)
    # b_ref  : (1, TE)  float32 -- bias slab (resident)
    # out_ref: (TN, TE) float32
    idx = idx_ref[...]                                     # (TN, 1)
    tn = idx_ref.shape[0]
    num_labels = wt_ref.shape[0]

    # Build the one-hot tile in-register: lane iota vs. broadcast index.
    # Out-of-range / negative labels give an all-zero row (bias-only output),
    # matching jax.nn.one_hot; PyTorch's F.one_hot would raise instead.
    col = jax.lax.broadcasted_iota(jnp.int32, (tn, num_labels), 1)
    onehot = (col == idx).astype(wt_ref.dtype)             # (TN, L)

    # Hot path: one_hot @ W^T on the MXU (f32 accumulate), then add bias.
    proj = jnp.dot(onehot, wt_ref[...], preferred_element_type=jnp.float32)
    out_ref[...] = (proj + b_ref[...].astype(jnp.float32)).astype(out_ref.dtype)


def prepare_onehot_proj_params(weight, bias, *, dtype=jnp.float32, lane=128):
    """One-time layout prep (hoisted out of the per-call path).

    weight: (E, L) as stored by nn.Linear; bias: (E,).
    Returns wt_pad: (L, E_pad) and b_pad: (1, E_pad), E_pad a multiple of 128.
    """
    E, L = weight.shape
    e_pad = _round_up(E, lane)
    wt = jnp.asarray(weight, dtype).T                                  # (L, E)
    wt = jnp.pad(wt, ((0, 0), (0, e_pad - E)))                         # (L, E_pad)
    b2d = jnp.pad(jnp.asarray(bias, dtype).reshape(1, E),
                  ((0, 0), (0, e_pad - E)))                            # (1, E_pad)
    return wt, b2d


@functools.partial(
    jax.jit,
    static_argnames=("embedding_size", "tile_n", "tile_e", "vmem_budget_bytes"))
def one_hot_proj_embedding(x, wt_pad, b_pad, *, embedding_size,
                           tile_n=512, tile_e=512,
                           vmem_budget_bytes=20 * 1024 * 1024):
    """x: (B, S, 1) integer; wt_pad: (L, E_pad); b_pad: (1, E_pad)."""
    B, S, one = x.shape
    assert one == 1
    L, e_pad = wt_pad.shape
    E = embedding_size
    N = B * S
    elt = jnp.dtype(wt_pad.dtype).itemsize

    # --- row tiling (pure padding, sliced off at the end) ---
    tn = min(tile_n, _round_up(N, 8))          # row tile (>= 8 sublanes)
    n_pad = _round_up(N, tn)

    idx2d = x.reshape(N, 1).astype(jnp.int32)
    if n_pad != N:
        # Padded rows get label -1 -> all-zero one-hot -> bias-only; sliced off.
        idx2d = jnp.pad(idx2d, ((0, n_pad - N), (0, 0)), constant_values=-1)

    # --- E tiling: keep the weight slab resident whenever it fits VMEM ---
    def step_bytes(te):
        # double-buffered weight slab + output tile + bias + idx block
        return 2 * (elt * (L * te + tn * te + te) + 4 * tn)

    if step_bytes(e_pad) <= vmem_budget_bytes:
        te = e_pad                              # single E tile: weight fetched once total
    else:
        te = min(_round_up(min(tile_e, e_pad), 128), e_pad)
        # shrink to a multiple of 128 that divides e_pad and fits the budget
        while te > 128 and (e_pad % te != 0 or step_bytes(te) > vmem_budget_bytes):
            te -= 128

    n_tiles = n_pad // tn
    e_tiles = e_pad // te

    if e_tiles == 1:
        # 1-D grid over rows; W^T and bias DMA'd once, revisited every step.
        grid = (n_tiles,)
        in_specs = [
            pl.BlockSpec((tn, 1), lambda i: (i, 0)),
            pl.BlockSpec((L, te), lambda i: (0, 0)),
            pl.BlockSpec((1, te), lambda i: (0, 0)),
        ]
        out_spec = pl.BlockSpec((tn, te), lambda i: (i, 0))
        dim_sem = ("parallel",)
        idx_fetches = 1
    else:
        # 2-D grid, ROW axis innermost: weight/bias block index is constant across
        # the inner sweep, so each weight tile is fetched once (not n_tiles times).
        grid = (e_tiles, n_tiles)
        in_specs = [
            pl.BlockSpec((tn, 1), lambda j, i: (i, 0)),
            pl.BlockSpec((L, te), lambda j, i: (0, j)),
            pl.BlockSpec((1, te), lambda j, i: (0, j)),
        ]
        out_spec = pl.BlockSpec((tn, te), lambda j, i: (i, j))
        dim_sem = ("parallel", "parallel")
        idx_fetches = e_tiles

    # Explicit VMEM cap derived from the actual per-step footprint (v7x: 64 MiB phys).
    vmem_limit = int(min(max(step_bytes(te) + (4 << 20), 16 << 20), 40 << 20))

    cost = pl.CostEstimate(
        flops=2 * n_pad * L * e_pad,
        transcendentals=0,
        bytes_accessed=(4 * idx_fetches * n_pad            # idx reads
                        + elt * L * e_pad                   # each weight tile fetched once
                        + elt * e_pad                       # bias
                        + 4 * n_pad * e_pad),               # output writes
    )

    out = pl.pallas_call(
        onehot_proj_kernel,
        out_shape=jax.ShapeDtypeStruct((n_pad, e_pad), jnp.float32),
        grid=grid,
        in_specs=in_specs,
        out_specs=out_spec,
        compiler_params=pltpu.CompilerParams(
            dimension_semantics=dim_sem,
            vmem_limit_bytes=vmem_limit),
        cost_estimate=cost,
    )(idx2d, wt_pad, b_pad)

    return out[:N, :E].reshape(B, S, E)


if __name__ == "__main__":
    key = jax.random.PRNGKey(0)

    def run_case(B, S, num_labels, embedding_size, case_key, **kw):
        k_idx, k_w, k_b = jax.random.split(case_key, 3)
        # Deterministic synthetic parameters (nn.Linear(num_labels, embedding_size)).
        weight = jax.random.normal(k_w, (embedding_size, num_labels), jnp.float32) * 0.05
        bias = jax.random.normal(k_b, (embedding_size,), jnp.float32) * 0.01
        # PyTorch asserts int64 labels; int32 is semantically identical for these values.
        x = jax.random.randint(k_idx, (B, S, 1), 0, num_labels, dtype=jnp.int32)

        # One-time layout prep (transpose + pad), hoisted out of the forward call.
        wt_pad, b_pad = prepare_onehot_proj_params(weight, bias)

        out = jax.block_until_ready(
            one_hot_proj_embedding(x, wt_pad, b_pad,
                                   embedding_size=embedding_size, **kw))

        # Pure-JAX reference (one_hot + linear).
        ref = jax.nn.one_hot(x.squeeze(-1), num_labels, dtype=jnp.float32) @ weight.T + bias
        assert out.shape == (B, S, embedding_size)
        assert jnp.allclose(out, ref, atol=1e-5, rtol=1e-5), "mismatch vs reference"

    k0, k1, k2 = jax.random.split(key, 3)
    # Small shape consistent with the module's forward (default embedding_size=128):
    # single-E-tile path, weight fully resident, 1-D grid.
    run_case(2, 8, 16, 128, k0)
    # Exercise the padding paths: N not a multiple of tile_n, E not a multiple of 128.
    run_case(4, 200, 40, 96, k1)
    # Force the 2-D (E-tiles, row-tiles) fallback path with a tiny VMEM budget to
    # exercise the row-innermost / weight-resident ordering at small shapes.
    run_case(3, 50, 48, 200, k2, vmem_budget_bytes=64 * 1024)

    print("KERNEL_OK")
</pallas_src>

<mosaic_0001>
module attributes {stable_mosaic.version = 11 : i64} {
  func.func @onehot_proj_kernel(%arg0: i32, %arg1: memref<16x1xi32, #tpu.memory_space<vmem>>, %arg2: memref<16x128xf32, #tpu.memory_space<vmem>>, %arg3: memref<1x128xf32, #tpu.memory_space<vmem>>, %arg4: memref<16x128xf32, #tpu.memory_space<vmem>>) attributes {dimension_semantics = [#tpu.dimension_semantics<parallel>], iteration_bounds = array<i64: 1>, scalar_prefetch = 0 : i64, scratch_operands = 0 : i64, tpu.core_type = #tpu.core_type<tc>, window_params = [{transform_indices = @transform_0, window_bounds = array<i64: 16, 1>}, {pipeline_mode = #tpu.pipeline_mode<synchronous>, transform_indices = @transform_1, window_bounds = array<i64: 16, 128>}, {pipeline_mode = #tpu.pipeline_mode<synchronous>, transform_indices = @transform_2, window_bounds = array<i64: 1, 128>}, {transform_indices = @transform_3, window_bounds = array<i64: 16, 128>}]} {
    %c0 = arith.constant 0 : index
    %c0_0 = arith.constant 0 : index
    %0 = vector.load %arg1[%c0, %c0_0] : memref<16x1xi32, #tpu.memory_space<vmem>>, vector<16x1xi32>
    %1 = tpu.iota {dimensions = array<i32: 1>} : vector<16x16xi32>
    %2 = vector.broadcast %0 : vector<16x1xi32> to vector<16x16xi32>
    %3 = arith.cmpi eq, %1, %2 : vector<16x16xi32>
    %4 = arith.extui %3 : vector<16x16xi1> to vector<16x16xi32>
    %5 = arith.sitofp %4 : vector<16x16xi32> to vector<16x16xf32>
    %c0_1 = arith.constant 0 : index
    %c0_2 = arith.constant 0 : index
    %6 = vector.load %arg2[%c0_1, %c0_2] : memref<16x128xf32, #tpu.memory_space<vmem>>, vector<16x128xf32>
    %cst = arith.constant dense<0.000000e+00> : vector<16x128xf32>
    %7 = tpu.matmul %5, %6, %cst {dimension_numbers = #tpu.dot_dimension_numbers<[1], [0], [0], [1], [0, 0, 1, 1], [], []>} : vector<16x16xf32>, vector<16x128xf32>, vector<16x128xf32> -> vector<16x128xf32>
    %c0_3 = arith.constant 0 : index
    %c0_4 = arith.constant 0 : index
    %8 = vector.load %arg3[%c0_3, %c0_4] : memref<1x128xf32, #tpu.memory_space<vmem>>, vector<1x128xf32>
    %9 = vector.broadcast %8 : vector<1x128xf32> to vector<16x128xf32>
    %10 = arith.addf %7, %9 : vector<16x128xf32>
    %c0_5 = arith.constant 0 : index
    %c0_6 = arith.constant 0 : index
    %11 = vector.load %arg4[%c0_5, %c0_6] : memref<16x128xf32, #tpu.memory_space<vmem>>, vector<16x128xf32>
    tpu.vector_store %arg4[%c0_5, %c0_6], %10 {strides = array<i32>} : memref<16x128xf32, #tpu.memory_space<vmem>>, vector<16x128xf32>,
    return
  }
  func.func @transform_0(%arg0: i32) -> (i32, i32) {
    %c0_i32 = arith.constant 0 : i32
    %c0_i32_0 = arith.constant 0 : i32
    return %arg0, %c0_i32 : i32, i32
  }
  func.func @transform_1(%arg0: i32) -> (i32, i32) {
    %c0_i32 = arith.constant 0 : i32
    %c0_i32_0 = arith.constant 0 : i32
    %c0_i32_1 = arith.constant 0 : i32
    return %c0_i32, %c0_i32_0 : i32, i32
  }
  func.func @transform_2(%arg0: i32) -> (i32, i32) {
    %c0_i32 = arith.constant 0 : i32
    %c0_i32_0 = arith.constant 0 : i32
    %c0_i32_1 = arith.constant 0 : i32
    return %c0_i32, %c0_i32_0 : i32, i32
  }
  func.func @transform_3(%arg0: i32) -> (i32, i32) {
    %c0_i32 = arith.constant 0 : i32
    %c0_i32_0 = arith.constant 0 : i32
    return %arg0, %c0_i32 : i32, i32
  }
}

</mosaic_0001>

<bundles_post_ra>
// kernel: one_hot_proj_embedding.1
= control target key start
LH: loop header
LB: loop body
LE: loop exit
PB: predicated region body
PF: predicated region fallthrough
CT: control target
= control target key end

     0   :  { %s242_s0 = inlined_call_operand.vmem [shape: s32[16,1], index: 0, kind: input, shape index: {}]   ;;  %s243_s1 = inlined_call_operand.vmem [shape: f32[16,128], index: 1, kind: input, shape index: {}]   ;;  %s244_s2 = inlined_call_operand.vmem [shape: f32[1,128], index: 2, kind: input, shape index: {}]   ;;  %s245_s3 = inlined_call_operand.hbm [shape: f32[16,128], index: 3, kind: output, shape index: {}]  }
   0x1   :  { %v15_v0 = vld [vmem:[%s242_s0] sm:$0xff] }
   0x2   :  { %8 = vsyncpa [#allocation3], 0  ;;  %v190_v1 = vmov 0   ;;  %v31_v2 = vld [vmem:[%s243_s1] sm:$0xff]  ;;  %v32_v3 = vld [vmem:[%s243_s1 + $0x8] sm:$0xff]  ;;  %v17_v6 = vlaneseq  ;;  %vm40_vm0 = vcmask 130048  }
   0x3   :  { %165 = vset.pattern.permute.xlu0 %v190_v1  ;;  %v156_v4 = vpack.c.bf16 %v32_v3, %v31_v2  ;;  %v16_v5 = vld [vmem:[%s242_s0 + $0x8] sm:$0xff]  ;;  %v191_v9 = vmov 0.0   ;;  %v142_v13 = vld [vmem:[%s244_s2] ss:$0 sm:$0xff]  ;;  %s192_s0 = smov [#allocation2]  }
   0x4   :  { %20 = vperm.xlu0 %165, %v15_v0   ;;  %v18_v7 = vand.u32 127, %v17_v6  ;;  %s129_s21 = sshll.u32 %s192_s0, 4  ;;  %s130_s21 = int_to_ptr.vmem [resolvable:$true] %s129_s21 }
   0x5   :  { %157 = vmatprep.subr.bf16.mxu0 %v156_v4  ;;  %s166_s22 = scalar_lea.vmem %s130_s21, 256  ;;  %p171_p1 = scmp.lt.s32.totalorder %s130_s21, %s130_s21 }
   0x6   :  { %159 = vmatpush3.bf16.msra.mxu0 %v156_v4  ;;  %p167_p0 = scmp.ne.s32.totalorder %s130_s21, %s166_s22  ;;  %p172_p2 = scmp.lt.s32.totalorder %s166_s22, %s166_s22 }
   0x8   :  { %23 = vperm.xlu0 %165, %v16_v5   ;;  %p173_p3 = por %p172_p2, %p171_p1 }
   0xa   :  { %p174_p4 = pnand %p173_p3, %p167_p0 }
  0x83   :  { %v21_v8 = vpop.permute.xlu0 %20 }
  0x84   :  { %vm25_vm1 = vcmp.eq.s32.totalorder %v18_v7, %v21_v8 }
  0x85   :  { %v140_v10 = vsel %vm25_vm1, 1.0, %v191_v9 }
  0x86   :  { %153 = vmatprep.mubr.msk.f32.mxu0 %vm40_vm0, %v140_v10 }
  0x87   :  { %v24_v11 = vpop.permute.xlu0 %23 }
  0x88   :  { %vm26_vm2 = vcmp.eq.s32.totalorder %v18_v7, %v24_v11 }
  0x89   :  { %v141_v12 = vsel %vm26_vm2, 1.0, %v191_v9 }
  0x8a   :  { %154 = vmatmul.mubr.msk.f32.vlgmr.msra.gmra.mrb[0].mxu0 %vm40_vm0, %v141_v12 }
 0x15d   :  { %v155_v14 = vpop.f32.mrb[0].mxu0 }
 0x15e   :  { %v119_v15 = vadd.f32 %v155_v14, %v142_v13  ;;  %v113_v16 = vpop.f32.mrb[1].mxu0 }
 0x15f   :  { %v114_v17 = vadd.f32 %v142_v13, %v113_v16 }
 0x160   :  { %123 = vst [vmem:[#allocation2 + $0x8] sm:$0xff] %v119_v15 }
 0x161   :  { %122 = vst [vmem:[#allocation2] sm:$0xff] %v114_v17 }
 0x162   :  { %177 = shalt.err (!%p174_p4)
}
 0x163   :  { %s178_s2 = scalar_lea.hbm %s245_s3, 256 }
 0x164   :  { %p179_p5 = scmp.ne.s32.totalorder %s245_s3, %s178_s2  ;;  %p182_p6 = scmp.lt.u32.totalorder %s178_s2, %s245_s3 }
 0x166   :  { %p184_p7 = pnand %p182_p6, %p179_p5 }
 0x168   :  { %187 = shalt.err (!%p184_p7)
}
 0x169   :  { %s193_s29 = smov 128   ;;  %s194_s30 = smov 8  }
 0x16a   :  { %135 = dma.vmem_to_hbm [thread:$0]  %s130_s21, 256, %s245_s3, [#allocation3], %s193_s29, %s193_s29, %s194_s30  }
 0x16b   :  { %188 = dma.done.wait [#allocation3], 256  }
 0x16c   :  { %189 = vsyncadd [#allocation3], 4294967040 }
 0x16d   :  { %139 = vsyncpa [#allocation3], 1 }

</bundles_post_ra>
